<compile_context>
chip_gen: v6e
topology: v6e:2x2x1
jax: 0.10.0
libtpu: 0.0.40
codegen_flags: <defaults>
</compile_context>

<pallas_src>
import functools

import jax
import jax.numpy as jnp
from jax import lax
from jax.experimental import pallas as pl
from jax.experimental.pallas import tpu as pltpu

C = 32      # channels (fixed by the module)
K = 5       # kernel size
PAD = 2     # padding
EPS = 1e-5  # BatchNorm eps


def _residual_unit_kernel(x_ref, w1_ref, w2_ref, pvec_ref, out_ref, col_ref, *, L):
    """x_ref: (C, N*L) f32; w*_ref: (C, K*C) bf16; pvec_ref: (C, 6) f32;
    out_ref: (C, N*L) f32; col_ref: (K*C, N*L) bf16 im2col scratch."""
    Cc, NL = x_ref.shape

    # Per-sample lane position -> boundary masks for the shifted conv taps.
    # Hoisted once and shared by both convs.
    lane = lax.broadcasted_iota(jnp.int32, (Cc, NL), 1)
    pos = lane % L
    masks = {}
    for s in range(-PAD, PAD + 1):
        if s > 0:
            masks[s] = pos < (L - s)
        elif s < 0:
            masks[s] = pos >= (-s)

    pv = pvec_ref[...]                                  # (C, 6) f32
    b1, g1, bt1 = pv[:, 0:1], pv[:, 1:2], pv[:, 2:3]
    b2, g2, bt2 = pv[:, 3:4], pv[:, 4:5], pv[:, 5:6]

    x = x_ref[...]                                      # (C, N*L) f32

    def conv_relu(v, w_ref, b):
        # Write the K shifted taps into rows [k*C:(k+1)*C] of the bf16 scratch
        # (sublane-aligned static stores), then one fused bf16 MXU matmul
        # (C, K*C) @ (K*C, N*L) for the whole batch.
        for k in range(K):
            s = k - PAD
            if s == 0:
                tap = v
            else:
                # rolled[:, j] = v[:, (j + s) % NL]; the mask zeroes lanes whose
                # within-sample position l has l + s outside [0, L) (conv padding
                # and per-sample boundaries of the folded batch axis).
                rolled = pltpu.roll(v, shift=(-s) % NL, axis=1)
                tap = jnp.where(masks[s], rolled, 0.0)
            col_ref[k * C:(k + 1) * C, :] = tap.astype(jnp.bfloat16)
        y = jnp.dot(w_ref[...], col_ref[...], preferred_element_type=jnp.float32)
        return jnp.maximum(y + b, 0.0)                  # bias + ReLU, f32

    def batchnorm(h, gamma, beta):
        # Training-mode BN over (N, L): two-pass (mean, centered sum-of-squares)
        # to avoid the E[x^2]-mean^2 cancellation for post-ReLU activations.
        inv_n = 1.0 / float(NL)
        mean = h.sum(axis=1, keepdims=True) * inv_n     # (C, 1)
        d = h - mean
        var = (d * d).sum(axis=1, keepdims=True) * inv_n  # biased variance
        scale = gamma * lax.rsqrt(var + EPS)            # (C, 1) -> EUP rsqrt
        return d * scale + beta                         # single FMA per element

    h = batchnorm(conv_relu(x, w1_ref, b1), g1, bt1)
    h = batchnorm(conv_relu(h, w2_ref, b2), g2, bt2)
    out_ref[...] = h + x                                # residual add


def _vmem_cap_bytes():
    try:
        return int(pltpu.get_tpu_info().vmem_capacity_bytes)
    except Exception:
        return 64 * 1024 * 1024  # conservative fallback (v7x per-core VMEM)


@jax.jit
def residual_unit_pallas(x_ncl, params):
    """x_ncl: (N, C=32, L) float32, same layout as the PyTorch module input."""
    w1, b1, g1, bt1, w2, b2, g2, bt2 = params
    N, Cc, L = x_ncl.shape
    assert Cc == C
    NL = N * L

    # PyTorch conv weight (C_out, C_in, K) -> (C_out, K*C_in), k-major so the
    # flattened column index k*C + c_in matches the in-kernel im2col row order.
    # bf16 operands -> single-pass MXU issue (accumulation stays f32).
    w1_flat = jnp.transpose(w1, (0, 2, 1)).reshape(C, K * C).astype(jnp.bfloat16)
    w2_flat = jnp.transpose(w2, (0, 2, 1)).reshape(C, K * C).astype(jnp.bfloat16)

    # Pack the six per-channel vectors into one (C, 6) input (1 DMA, not 6).
    pvec = jnp.stack([b1, g1, bt1, b2, g2, bt2], axis=1).astype(jnp.float32)

    # Fold the batch into the lane axis: (N, C, L) -> (C, N*L).  Wrapper-side
    # layout plumbing so the kernel sees one lane-dense slab per conv matmul.
    x_slab = jnp.transpose(x_ncl.astype(jnp.float32), (1, 0, 2)).reshape(C, NL)

    vmem = pl.BlockSpec(memory_space=pltpu.MemorySpace.VMEM)

    # Size the VMEM budget from the resident footprint (with headroom), capped
    # well below the physical capacity, instead of requesting all of it.
    f32_slab = C * NL * 4
    footprint = (
        4 * f32_slab            # x, out, ~2 live f32 intermediates
        + K * C * NL * 2        # bf16 im2col scratch
        + 2 * C * K * C * 2     # bf16 weights
        + C * 6 * 4             # packed per-channel vectors
    )
    vmem_limit = int(min(_vmem_cap_bytes() * 3 // 4,
                         max(32 * 1024 * 1024, 2 * footprint)))

    out_slab = pl.pallas_call(
        functools.partial(_residual_unit_kernel, L=L),
        out_shape=jax.ShapeDtypeStruct((C, NL), jnp.float32),
        in_specs=[vmem] * 4,
        out_specs=vmem,
        scratch_shapes=[pltpu.VMEM((K * C, NL), jnp.bfloat16)],
        compiler_params=pltpu.CompilerParams(vmem_limit_bytes=vmem_limit),
    )(x_slab, w1_flat, w2_flat, pvec)

    return out_slab.reshape(C, N, L).transpose(1, 0, 2)  # back to (N, C, L)


def _ref_forward(x_ncl, params):
    """Pure-JAX reference replicating the PyTorch forward (training-mode BN)."""
    w1, b1, g1, bt1, w2, b2, g2, bt2 = params

    def conv1d(x, w, b):
        y = lax.conv_general_dilated(
            x, w, window_strides=(1,), padding=((PAD, PAD),),
            dimension_numbers=('NCH', 'OIH', 'NCH'))
        return y + b[None, :, None]

    def bn(x, g, bt):
        m = jnp.mean(x, axis=(0, 2), keepdims=True)
        v = jnp.mean(jnp.square(x - m), axis=(0, 2), keepdims=True)
        return (x - m) * lax.rsqrt(v + EPS) * g[None, :, None] + bt[None, :, None]

    h = bn(jnp.maximum(conv1d(x_ncl, w1, b1), 0.0), g1, bt1)
    h = bn(jnp.maximum(conv1d(h, w2, b2), 0.0), g2, bt2)
    return h + x_ncl


def make_params(key):
    keys = jax.random.split(key, 8)
    fan_in = C * K
    bound = 1.0 / (fan_in ** 0.5)
    w1 = jax.random.uniform(keys[0], (C, C, K), jnp.float32, -bound, bound)
    b1 = jax.random.uniform(keys[1], (C,), jnp.float32, -bound, bound)
    w2 = jax.random.uniform(keys[2], (C, C, K), jnp.float32, -bound, bound)
    b2 = jax.random.uniform(keys[3], (C,), jnp.float32, -bound, bound)
    # BatchNorm affine params (PyTorch init is gamma=1, beta=0; perturb so the
    # affine path is exercised).
    g1 = 1.0 + 0.1 * jax.random.normal(keys[4], (C,), jnp.float32)
    bt1 = 0.1 * jax.random.normal(keys[5], (C,), jnp.float32)
    g2 = 1.0 + 0.1 * jax.random.normal(keys[6], (C,), jnp.float32)
    bt2 = 0.1 * jax.random.normal(keys[7], (C,), jnp.float32)
    return (w1, b1, g1, bt1, w2, b2, g2, bt2)


if __name__ == "__main__":
    key = jax.random.PRNGKey(0)
    pkey, xkey = jax.random.split(key)
    params = make_params(pkey)

    N, L = 2, 128   # (batch, channels=32, length); L sits on the 128-wide lane axis
    x = jax.random.normal(xkey, (N, C, L), jnp.float32)

    out = jax.block_until_ready(residual_unit_pallas(x, params))
    ref = _ref_forward(x, params)

    assert out.shape == (N, C, L)
    # bf16 MXU operands (f32 accumulation) -> loosened tolerance vs. the f32 reference.
    max_err = float(jnp.max(jnp.abs(out - ref)))
    assert jnp.allclose(out, ref, rtol=5e-2, atol=5e-2), (
        f"mismatch vs. JAX reference (max |err| = {max_err})")

    print("KERNEL_OK")
</pallas_src>

<mosaic_0001>
module attributes {stable_mosaic.version = 11 : i64} {
  func.func @_residual_unit_kernel(%arg0: memref<32x256xf32, #tpu.memory_space<vmem>>, %arg1: memref<32x160xbf16, #tpu.memory_space<vmem>>, %arg2: memref<32x160xbf16, #tpu.memory_space<vmem>>, %arg3: memref<32x6xf32, #tpu.memory_space<vmem>>, %arg4: memref<32x256xf32, #tpu.memory_space<vmem>>, %arg5: memref<160x256xbf16, #tpu.memory_space<vmem>>) attributes {dimension_semantics = [], scalar_prefetch = 0 : i64, scratch_operands = 1 : i64, tpu.core_type = #tpu.core_type<tc>} {
    %0 = tpu.iota {dimensions = array<i32: 1>} : vector<32x256xi32>
    %c128_i32 = arith.constant 128 : i32
    %c0_i32 = arith.constant 0 : i32
    %1 = arith.cmpi eq, %c128_i32, %c0_i32 : i32
    %c1_i32 = arith.constant 1 : i32
    %2 = arith.select %1, %c1_i32, %c128_i32 : i32
    %3 = vector.broadcast %2 : i32 to vector<32x256xi32>
    %4 = arith.remsi %0, %3 : vector<32x256xi32>
    %c0_i32_0 = arith.constant 0 : i32
    %5 = vector.broadcast %c0_i32_0 : i32 to vector<32x256xi32>
    %6 = arith.cmpi ne, %4, %5 : vector<32x256xi32>
    %c0_i32_1 = arith.constant 0 : i32
    %7 = vector.broadcast %c0_i32_1 : i32 to vector<32x256xi32>
    %8 = arith.cmpi slt, %4, %7 : vector<32x256xi32>
    %c0_i32_2 = arith.constant 0 : i32
    %9 = arith.cmpi slt, %2, %c0_i32_2 : i32
    %10 = vector.broadcast %9 : i1 to vector<32x256xi1>
    %11 = vector.broadcast %10 : vector<32x256xi1> to vector<32x256xi1>
    %12 = arith.xori %8, %11 : vector<32x256xi1>
    %13 = arith.andi %12, %6 : vector<32x256xi1>
    %14 = vector.broadcast %2 : i32 to vector<32x256xi32>
    %15 = arith.addi %4, %14 : vector<32x256xi32>
    %16 = arith.select %13, %15, %4 : vector<32x256xi1>, vector<32x256xi32>
    %c2_i32 = arith.constant 2 : i32
    %17 = vector.broadcast %c2_i32 : i32 to vector<32x256xi32>
    %18 = arith.cmpi sge, %16, %17 : vector<32x256xi32>
    %c1_i32_3 = arith.constant 1 : i32
    %19 = vector.broadcast %c1_i32_3 : i32 to vector<32x256xi32>
    %20 = arith.cmpi sge, %16, %19 : vector<32x256xi32>
    %c127_i32 = arith.constant 127 : i32
    %21 = vector.broadcast %c127_i32 : i32 to vector<32x256xi32>
    %22 = arith.cmpi slt, %16, %21 : vector<32x256xi32>
    %c126_i32 = arith.constant 126 : i32
    %23 = vector.broadcast %c126_i32 : i32 to vector<32x256xi32>
    %24 = arith.cmpi slt, %16, %23 : vector<32x256xi32>
    %c0 = arith.constant 0 : index
    %c0_4 = arith.constant 0 : index
    %25 = vector.load %arg3[%c0, %c0_4] : memref<32x6xf32, #tpu.memory_space<vmem>>, vector<32x6xf32>
    %26 = vector.extract_strided_slice %25 {offsets = [0, 0], sizes = [32, 1], strides = [1, 1]} : vector<32x6xf32> to vector<32x1xf32>
    %27 = vector.extract_strided_slice %25 {offsets = [0, 1], sizes = [32, 1], strides = [1, 1]} : vector<32x6xf32> to vector<32x1xf32>
    %28 = vector.extract_strided_slice %25 {offsets = [0, 2], sizes = [32, 1], strides = [1, 1]} : vector<32x6xf32> to vector<32x1xf32>
    %29 = vector.extract_strided_slice %25 {offsets = [0, 3], sizes = [32, 1], strides = [1, 1]} : vector<32x6xf32> to vector<32x1xf32>
    %30 = vector.extract_strided_slice %25 {offsets = [0, 4], sizes = [32, 1], strides = [1, 1]} : vector<32x6xf32> to vector<32x1xf32>
    %31 = vector.extract_strided_slice %25 {offsets = [0, 5], sizes = [32, 1], strides = [1, 1]} : vector<32x6xf32> to vector<32x1xf32>
    %c0_5 = arith.constant 0 : index
    %c0_6 = arith.constant 0 : index
    %32 = vector.load %arg0[%c0_5, %c0_6] : memref<32x256xf32, #tpu.memory_space<vmem>>, vector<32x256xf32>
    %c2_i32_7 = arith.constant 2 : i32
    %33 = tpu.dynamic_rotate %32 by %c2_i32_7 dim 1 : vector<32x256xf32>, i32 -> vector<32x256xf32>
    %cst = arith.constant 0.000000e+00 : f32
    %34 = vector.broadcast %cst : f32 to vector<32x256xf32>
    %35 = arith.select %18, %33, %34 : vector<32x256xi1>, vector<32x256xf32>
    %36 = arith.truncf %35 : vector<32x256xf32> to vector<32x256xbf16>
    %c0_8 = arith.constant 0 : index
    %c0_9 = arith.constant 0 : index
    %37 = vector.load %arg5[%c0_8, %c0_9] : memref<160x256xbf16, #tpu.memory_space<vmem>>, vector<32x256xbf16>
    tpu.vector_store %arg5[%c0_8, %c0_9], %36 {strides = array<i32>} : memref<160x256xbf16, #tpu.memory_space<vmem>>, vector<32x256xbf16>,
    %c1_i32_10 = arith.constant 1 : i32
    %38 = tpu.dynamic_rotate %32 by %c1_i32_10 dim 1 : vector<32x256xf32>, i32 -> vector<32x256xf32>
    %cst_11 = arith.constant 0.000000e+00 : f32
    %39 = vector.broadcast %cst_11 : f32 to vector<32x256xf32>
    %40 = arith.select %20, %38, %39 : vector<32x256xi1>, vector<32x256xf32>
    %41 = arith.truncf %40 : vector<32x256xf32> to vector<32x256xbf16>
    %c32 = arith.constant 32 : index
    %c0_12 = arith.constant 0 : index
    %42 = vector.load %arg5[%c32, %c0_12] : memref<160x256xbf16, #tpu.memory_space<vmem>>, vector<32x256xbf16>
    tpu.vector_store %arg5[%c32, %c0_12], %41 {strides = array<i32>} : memref<160x256xbf16, #tpu.memory_space<vmem>>, vector<32x256xbf16>,
    %43 = arith.truncf %32 : vector<32x256xf32> to vector<32x256xbf16>
    %c64 = arith.constant 64 : index
    %c0_13 = arith.constant 0 : index
    %44 = vector.load %arg5[%c64, %c0_13] : memref<160x256xbf16, #tpu.memory_space<vmem>>, vector<32x256xbf16>
    tpu.vector_store %arg5[%c64, %c0_13], %43 {strides = array<i32>} : memref<160x256xbf16, #tpu.memory_space<vmem>>, vector<32x256xbf16>,
    %c255_i32 = arith.constant 255 : i32
    %45 = tpu.dynamic_rotate %32 by %c255_i32 dim 1 : vector<32x256xf32>, i32 -> vector<32x256xf32>
    %cst_14 = arith.constant 0.000000e+00 : f32
    %46 = vector.broadcast %cst_14 : f32 to vector<32x256xf32>
    %47 = arith.select %22, %45, %46 : vector<32x256xi1>, vector<32x256xf32>
    %48 = arith.truncf %47 : vector<32x256xf32> to vector<32x256xbf16>
    %c96 = arith.constant 96 : index
    %c0_15 = arith.constant 0 : index
    %49 = vector.load %arg5[%c96, %c0_15] : memref<160x256xbf16, #tpu.memory_space<vmem>>, vector<32x256xbf16>
    tpu.vector_store %arg5[%c96, %c0_15], %48 {strides = array<i32>} : memref<160x256xbf16, #tpu.memory_space<vmem>>, vector<32x256xbf16>,
    %c254_i32 = arith.constant 254 : i32
    %50 = tpu.dynamic_rotate %32 by %c254_i32 dim 1 : vector<32x256xf32>, i32 -> vector<32x256xf32>
    %cst_16 = arith.constant 0.000000e+00 : f32
    %51 = vector.broadcast %cst_16 : f32 to vector<32x256xf32>
    %52 = arith.select %24, %50, %51 : vector<32x256xi1>, vector<32x256xf32>
    %53 = arith.truncf %52 : vector<32x256xf32> to vector<32x256xbf16>
    %c128 = arith.constant 128 : index
    %c0_17 = arith.constant 0 : index
    %54 = vector.load %arg5[%c128, %c0_17] : memref<160x256xbf16, #tpu.memory_space<vmem>>, vector<32x256xbf16>
    tpu.vector_store %arg5[%c128, %c0_17], %53 {strides = array<i32>} : memref<160x256xbf16, #tpu.memory_space<vmem>>, vector<32x256xbf16>,
    %c0_18 = arith.constant 0 : index
    %c0_19 = arith.constant 0 : index
    %55 = vector.load %arg1[%c0_18, %c0_19] : memref<32x160xbf16, #tpu.memory_space<vmem>>, vector<32x160xbf16>
    %c0_20 = arith.constant 0 : index
    %c0_21 = arith.constant 0 : index
    %56 = vector.load %arg5[%c0_20, %c0_21] : memref<160x256xbf16, #tpu.memory_space<vmem>>, vector<160x256xbf16>
    %cst_22 = arith.constant dense<0.000000e+00> : vector<32x256xf32>
    %57 = tpu.matmul %55, %56, %cst_22 {dimension_numbers = #tpu.dot_dimension_numbers<[1], [0], [0], [1], [0, 0, 1, 1], [], []>} : vector<32x160xbf16>, vector<160x256xbf16>, vector<32x256xf32> -> vector<32x256xf32>
    %58 = vector.broadcast %26 : vector<32x1xf32> to vector<32x256xf32>
    %59 = arith.addf %57, %58 : vector<32x256xf32>
    %cst_23 = arith.constant 0.000000e+00 : f32
    %60 = vector.broadcast %cst_23 : f32 to vector<32x256xf32>
    %61 = arith.maximumf %59, %60 : vector<32x256xf32>
    %cst_24 = arith.constant dense<0.000000e+00> : vector<32xf32>
    %62 = vector.multi_reduction <add>, %61, %cst_24 [1] : vector<32x256xf32> to vector<32xf32>
    %63 = vector.shape_cast %62 : vector<32xf32> to vector<32x1xf32>
    %cst_25 = arith.constant 3.906250e-03 : f32
    %64 = vector.broadcast %cst_25 : f32 to vector<32x1xf32>
    %65 = arith.mulf %63, %64 : vector<32x1xf32>
    %66 = vector.broadcast %65 : vector<32x1xf32> to vector<32x256xf32>
    %67 = arith.subf %61, %66 : vector<32x256xf32>
    %68 = arith.mulf %67, %67 : vector<32x256xf32>
    %cst_26 = arith.constant dense<0.000000e+00> : vector<32xf32>
    %69 = vector.multi_reduction <add>, %68, %cst_26 [1] : vector<32x256xf32> to vector<32xf32>
    %70 = vector.shape_cast %69 : vector<32xf32> to vector<32x1xf32>
    %cst_27 = arith.constant 3.906250e-03 : f32
    %71 = vector.broadcast %cst_27 : f32 to vector<32x1xf32>
    %72 = arith.mulf %70, %71 : vector<32x1xf32>
    %cst_28 = arith.constant 9.99999974E-6 : f32
    %73 = vector.broadcast %cst_28 : f32 to vector<32x1xf32>
    %74 = arith.addf %72, %73 : vector<32x1xf32>
    %75 = math.rsqrt %74 : vector<32x1xf32>
    %76 = arith.mulf %27, %75 : vector<32x1xf32>
    %77 = vector.broadcast %76 : vector<32x1xf32> to vector<32x256xf32>
    %78 = arith.mulf %67, %77 : vector<32x256xf32>
    %79 = vector.broadcast %28 : vector<32x1xf32> to vector<32x256xf32>
    %80 = arith.addf %78, %79 : vector<32x256xf32>
    %c2_i32_29 = arith.constant 2 : i32
    %81 = tpu.dynamic_rotate %80 by %c2_i32_29 dim 1 : vector<32x256xf32>, i32 -> vector<32x256xf32>
    %cst_30 = arith.constant 0.000000e+00 : f32
    %82 = vector.broadcast %cst_30 : f32 to vector<32x256xf32>
    %83 = arith.select %18, %81, %82 : vector<32x256xi1>, vector<32x256xf32>
    %84 = arith.truncf %83 : vector<32x256xf32> to vector<32x256xbf16>
    %c0_31 = arith.constant 0 : index
    %c0_32 = arith.constant 0 : index
    %85 = vector.load %arg5[%c0_31, %c0_32] : memref<160x256xbf16, #tpu.memory_space<vmem>>, vector<32x256xbf16>
    tpu.vector_store %arg5[%c0_31, %c0_32], %84 {strides = array<i32>} : memref<160x256xbf16, #tpu.memory_space<vmem>>, vector<32x256xbf16>,
    %c1_i32_33 = arith.constant 1 : i32
    %86 = tpu.dynamic_rotate %80 by %c1_i32_33 dim 1 : vector<32x256xf32>, i32 -> vector<32x256xf32>
    %cst_34 = arith.constant 0.000000e+00 : f32
    %87 = vector.broadcast %cst_34 : f32 to vector<32x256xf32>
    %88 = arith.select %20, %86, %87 : vector<32x256xi1>, vector<32x256xf32>
    %89 = arith.truncf %88 : vector<32x256xf32> to vector<32x256xbf16>
    %c32_35 = arith.constant 32 : index
    %c0_36 = arith.constant 0 : index
    %90 = vector.load %arg5[%c32_35, %c0_36] : memref<160x256xbf16, #tpu.memory_space<vmem>>, vector<32x256xbf16>
    tpu.vector_store %arg5[%c32_35, %c0_36], %89 {strides = array<i32>} : memref<160x256xbf16, #tpu.memory_space<vmem>>, vector<32x256xbf16>,
    %91 = arith.truncf %80 : vector<32x256xf32> to vector<32x256xbf16>
    %c64_37 = arith.constant 64 : index
    %c0_38 = arith.constant 0 : index
    %92 = vector.load %arg5[%c64_37, %c0_38] : memref<160x256xbf16, #tpu.memory_space<vmem>>, vector<32x256xbf16>
    tpu.vector_store %arg5[%c64_37, %c0_38], %91 {strides = array<i32>} : memref<160x256xbf16, #tpu.memory_space<vmem>>, vector<32x256xbf16>,
    %c255_i32_39 = arith.constant 255 : i32
    %93 = tpu.dynamic_rotate %80 by %c255_i32_39 dim 1 : vector<32x256xf32>, i32 -> vector<32x256xf32>
    %cst_40 = arith.constant 0.000000e+00 : f32
    %94 = vector.broadcast %cst_40 : f32 to vector<32x256xf32>
    %95 = arith.select %22, %93, %94 : vector<32x256xi1>, vector<32x256xf32>
    %96 = arith.truncf %95 : vector<32x256xf32> to vector<32x256xbf16>
    %c96_41 = arith.constant 96 : index
    %c0_42 = arith.constant 0 : index
    %97 = vector.load %arg5[%c96_41, %c0_42] : memref<160x256xbf16, #tpu.memory_space<vmem>>, vector<32x256xbf16>
    tpu.vector_store %arg5[%c96_41, %c0_42], %96 {strides = array<i32>} : memref<160x256xbf16, #tpu.memory_space<vmem>>, vector<32x256xbf16>,
    %c254_i32_43 = arith.constant 254 : i32
    %98 = tpu.dynamic_rotate %80 by %c254_i32_43 dim 1 : vector<32x256xf32>, i32 -> vector<32x256xf32>
    %cst_44 = arith.constant 0.000000e+00 : f32
    %99 = vector.broadcast %cst_44 : f32 to vector<32x256xf32>
    %100 = arith.select %24, %98, %99 : vector<32x256xi1>, vector<32x256xf32>
    %101 = arith.truncf %100 : vector<32x256xf32> to vector<32x256xbf16>
    %c128_45 = arith.constant 128 : index
    %c0_46 = arith.constant 0 : index
    %102 = vector.load %arg5[%c128_45, %c0_46] : memref<160x256xbf16, #tpu.memory_space<vmem>>, vector<32x256xbf16>
    tpu.vector_store %arg5[%c128_45, %c0_46], %101 {strides = array<i32>} : memref<160x256xbf16, #tpu.memory_space<vmem>>, vector<32x256xbf16>,
    %c0_47 = arith.constant 0 : index
    %c0_48 = arith.constant 0 : index
    %103 = vector.load %arg2[%c0_47, %c0_48] : memref<32x160xbf16, #tpu.memory_space<vmem>>, vector<32x160xbf16>
    %c0_49 = arith.constant 0 : index
    %c0_50 = arith.constant 0 : index
    %104 = vector.load %arg5[%c0_49, %c0_50] : memref<160x256xbf16, #tpu.memory_space<vmem>>, vector<160x256xbf16>
    %cst_51 = arith.constant dense<0.000000e+00> : vector<32x256xf32>
    %105 = tpu.matmul %103, %104, %cst_51 {dimension_numbers = #tpu.dot_dimension_numbers<[1], [0], [0], [1], [0, 0, 1, 1], [], []>} : vector<32x160xbf16>, vector<160x256xbf16>, vector<32x256xf32> -> vector<32x256xf32>
    %106 = vector.broadcast %29 : vector<32x1xf32> to vector<32x256xf32>
    %107 = arith.addf %105, %106 : vector<32x256xf32>
    %cst_52 = arith.constant 0.000000e+00 : f32
    %108 = vector.broadcast %cst_52 : f32 to vector<32x256xf32>
    %109 = arith.maximumf %107, %108 : vector<32x256xf32>
    %cst_53 = arith.constant dense<0.000000e+00> : vector<32xf32>
    %110 = vector.multi_reduction <add>, %109, %cst_53 [1] : vector<32x256xf32> to vector<32xf32>
    %111 = vector.shape_cast %110 : vector<32xf32> to vector<32x1xf32>
    %cst_54 = arith.constant 3.906250e-03 : f32
    %112 = vector.broadcast %cst_54 : f32 to vector<32x1xf32>
    %113 = arith.mulf %111, %112 : vector<32x1xf32>
    %114 = vector.broadcast %113 : vector<32x1xf32> to vector<32x256xf32>
    %115 = arith.subf %109, %114 : vector<32x256xf32>
    %116 = arith.mulf %115, %115 : vector<32x256xf32>
    %cst_55 = arith.constant dense<0.000000e+00> : vector<32xf32>
    %117 = vector.multi_reduction <add>, %116, %cst_55 [1] : vector<32x256xf32> to vector<32xf32>
    %118 = vector.shape_cast %117 : vector<32xf32> to vector<32x1xf32>
    %cst_56 = arith.constant 3.906250e-03 : f32
    %119 = vector.broadcast %cst_56 : f32 to vector<32x1xf32>
    %120 = arith.mulf %118, %119 : vector<32x1xf32>
    %cst_57 = arith.constant 9.99999974E-6 : f32
    %121 = vector.broadcast %cst_57 : f32 to vector<32x1xf32>
    %122 = arith.addf %120, %121 : vector<32x1xf32>
    %123 = math.rsqrt %122 : vector<32x1xf32>
    %124 = arith.mulf %30, %123 : vector<32x1xf32>
    %125 = vector.broadcast %124 : vector<32x1xf32> to vector<32x256xf32>
    %126 = arith.mulf %115, %125 : vector<32x256xf32>
    %127 = vector.broadcast %31 : vector<32x1xf32> to vector<32x256xf32>
    %128 = arith.addf %126, %127 : vector<32x256xf32>
    %129 = arith.addf %128, %32 : vector<32x256xf32>
    %c0_58 = arith.constant 0 : index
    %c0_59 = arith.constant 0 : index
    %130 = vector.load %arg4[%c0_58, %c0_59] : memref<32x256xf32, #tpu.memory_space<vmem>>, vector<32x256xf32>
    tpu.vector_store %arg4[%c0_58, %c0_59], %129 {strides = array<i32>} : memref<32x256xf32, #tpu.memory_space<vmem>>, vector<32x256xf32>,
    return
  }
}

</mosaic_0001>

<bundles_post_ra>
// kernel: residual_unit_pallas.1
= control target key start
LH: loop header
LB: loop body
LE: loop exit
PB: predicated region body
PF: predicated region fallthrough
CT: control target
= control target key end

     0   :  { %s1796_s5 = smov 127   ;;  %s1797_s6 = smov 1   ;;  %vm499_vm0 = vcmask 261120   ;;  %v1800_v13 = vmov 0   ;;  %v18_v18 = vlaneseq  ;;  %s2412_s0 = inlined_call_operand.vmem [shape: f32[32,256], index: 0, kind: input, shape index: {}]   ;;  %s2413_s1 = inlined_call_operand.vmem [shape: bf16[32,160], index: 1, kind: input, shape index: {}]   ;;  %s2414_s3 = inlined_call_operand.vmem [shape: f32[32,6], index: 3, kind: input, shape index: {}]   ;;  %s2415_s2 = inlined_call_operand.vmem [shape: bf16[32,160], index: 2, kind: input, shape index: {}]   ;;  %s2416_s4 = inlined_call_operand.vmem [shape: f32[32,256], index: 4, kind: output, shape index: {}]  }
   0x1   :  { %v1834_v0 = vld [vmem:[%s2412_s0 + $0x20] sm:$0xff]  ;;  %v1839_v1 = vld [vmem:[%s2412_s0 + $0x30] sm:$0xff]  ;;  %v1856_v5 = vld [vmem:[%s2412_s0 + $0x28] sm:$0xff]  ;;  %s1798_s7 = smov 2   ;;  %s1799_s8 = smov 126   ;;  %1663 = vset.pattern.permute.xlu1 %v1800_v13  ;;  %1662 = vset.pattern.permute.xlu0 %v1800_v13 }
   0x2   :  { %v1844_v2 = vld [vmem:[%s2412_s0] sm:$0xff]  ;;  %v1582_v3 = vpack.i.bf16 %v1839_v1, %v1834_v0  ;;  %v1851_v4 = vld [vmem:[%s2412_s0 + $0x10] sm:$0xff]  ;;  %v1861_v6 = vld [vmem:[%s2412_s0 + $0x38] sm:$0xff]  ;;  %v1923_v19 = vand.u32 127, %v18_v18  ;;  %v1446_v57 = vpack.c.bf16 %v1839_v1, %v1834_v0 }
   0x3   :  { %v1592_v7 = vpack.i.bf16 %v1851_v4, %v1844_v2  ;;  %v1868_v8 = vld [vmem:[%s2412_s0 + $0x8] sm:$0xff]  ;;  %v1873_v9 = vld [vmem:[%s2412_s0 + $0x18] sm:$0xff]  ;;  %v1587_v10 = vpack.i.bf16 %v1861_v6, %v1856_v5  ;;  %v1907_v15 = vld [vmem:[%s2414_s3 + $0x10] sm:$0xff]  ;;  %v1447_v49 = vpack.c.bf16 %v1861_v6, %v1856_v5 }
   0x4   :  { %1583 = vrot.lane.b32.xlu0 %v1582_v3, %s1796_s5  ;;  %v1597_v11 = vpack.i.bf16 %v1873_v9, %v1868_v8  ;;  %v1758_v12 = vld [vmem:[%s2413_s1 + $0x4] ss:$8 sps:$4 sm:$0xff]   ;;  %v1902_v14 = vld [vmem:[%s2414_s3 + $0x18] sm:$0xff]  ;;  %v20_v20 = vadd.s32 128, %v1923_v19  ;;  %vm49_vm1 = vcmp.lt.s32.totalorder %v1923_v19, 127  ;;  %vm142_vm5 = vcmp.lt.s32.totalorder %v1923_v19, 1 }
   0x5   :  { %1593 = vrot.lane.b32.xlu1 %v1592_v7, %s1796_s5  ;;  %1348 = vmatprep.mubr.msk.bf16.mxu0 %vm499_vm0, %v1758_v12  ;;  %v1914_v16 = vld [vmem:[%s2414_s3] sm:$0xff]  ;;  %v1919_v17 = vld [vmem:[%s2414_s3 + $0x8] sm:$0xff]  ;;  %vm1949_vm4 = vmpackc.low %vm49_vm1, %vm49_vm1  ;;  %v1445_v61 = vpack.c.bf16 %v1873_v9, %v1868_v8  ;;  %vm47_vm8 = vcmp.ge.s32.totalorder %v1923_v19, 1  ;;  %vm81_vm9 = vcmp.lt.s32.totalorder %v1923_v19, 2  ;;  %vm45_vm13 = vcmp.ge.s32.totalorder %v1923_v19, 2 }
   0x6   :  { %v1926_v22 = vand.u32 127, %v20_v20  ;;  %vm1999_vm10 = vmpackc.low %vm47_vm8, %vm47_vm8  ;;  %vm51_vm14 = vcmp.lt.s32.totalorder %v1923_v19, 126  ;;  %v1765_v19 = vld [vmem:[%s2415_s2 + $0x14] ss:$8 sps:$4 sm:$0xff]  }
   0x7   :  { %vm2034_vm15 = vmpackc.low %vm45_vm13, %vm45_vm13 }
   0x8   :  { %1588 = vrot.lane.b32.xlu0 %v1587_v10, %s1796_s5  ;;  %vm50_vm2 = vcmp.lt.s32.totalorder %v1926_v22, 127  ;;  %vm48_vm6 = vcmp.ge.s32.totalorder %v1926_v22, 1  ;;  %vm46_vm11 = vcmp.ge.s32.totalorder %v1926_v22, 2  ;;  %vm2070_vm8 = vmpackc.low %vm51_vm14, %vm51_vm14 }
   0x9   :  { %1598 = vrot.lane.b32.xlu1 %v1597_v11, %s1796_s5  ;;  %vm1942_vm3 = vmpackc.low %vm50_vm2, %vm50_vm2  ;;  %vm52_vm2 = vcmp.lt.s32.totalorder %v1926_v22, 126 }
   0xa   :  { %vm1987_vm7 = vmpackc.low %vm48_vm6, %vm48_vm6 }
   0xb   :  { %vm2020_vm12 = vmpackc.low %vm46_vm11, %vm46_vm11 }
   0xc   :  { %1603 = vrot.lane.b32.xlu0 %v1582_v3, %s1797_s6  ;;  %vm2055_vm6 = vmpackc.low %vm52_vm2, %vm52_vm2 }
   0xd   :  { %1608 = vrot.lane.b32.xlu1 %v1587_v10, %s1797_s6 }
  0x10   :  { %1613 = vrot.lane.b32.xlu0 %v1592_v7, %s1797_s6 }
  0x11   :  { %1618 = vrot.lane.b32.xlu1 %v1597_v11, %s1797_s6 }
  0x14   :  { %1623 = vrot.lane.b32.xlu0 %v1582_v3, %s1798_s7 }
  0x15   :  { %1628 = vrot.lane.b32.xlu1 %v1587_v10, %s1798_s7 }
  0x18   :  { %1633 = vrot.lane.b32.xlu0 %v1592_v7, %s1798_s7 }
  0x19   :  { %1638 = vrot.lane.b32.xlu1 %v1597_v11, %s1798_s7 }
  0x1c   :  { %1643 = vrot.lane.b32.xlu0 %v1582_v3, %s1799_s8 }
  0x1d   :  { %1648 = vrot.lane.b32.xlu1 %v1587_v10, %s1799_s8  ;;  %v1444_v10 = vpack.c.bf16 %v1851_v4, %v1844_v2 }
  0x20   :  { %1653 = vrot.lane.b32.xlu0 %v1592_v7, %s1799_s8 }
  0x21   :  { %1658 = vrot.lane.b32.xlu1 %v1597_v11, %s1799_s8 }
  0x24   :  { %373 = vperm.xlu0 %1662, %v1907_v15  }
  0x25   :  { %378 = vperm.xlu1 %1663, %v1902_v14  }
  0x28   :  { %368 = vperm.xlu0 %1662, %v1919_v17  }
  0x29   :  { %363 = vperm.xlu1 %1663, %v1914_v16  }
  0x76   :  { %v1584_v21 = vpop.permute.xlu0 %1583 }
  0x77   :  { %v1594_v23 = vpop.permute.xlu1 %1593  ;;  %v1586_v27 = vunpack.i.h.bf16 %v1584_v21  ;;  %v1585_v28 = vunpack.i.l.bf16 %v1584_v21 }
  0x78   :  { %v1596_v24 = vunpack.i.h.bf16 %v1594_v23  ;;  %v1595_v25 = vunpack.i.l.bf16 %v1594_v23 }
  0x7a   :  { %v1589_v26 = vpop.permute.xlu0 %1588 }
  0x7b   :  { %v1591_v29 = vunpack.i.h.bf16 %v1589_v26  ;;  %v1590_v30 = vunpack.i.l.bf16 %v1589_v26  ;;  %v1599_v31 = vpop.permute.xlu1 %1598 }
  0x7c   :  { %v1601_v32 = vunpack.i.h.bf16 %v1599_v31  ;;  %v1600_v33 = vunpack.i.l.bf16 %v1599_v31 }
  0x7d   :  { %v238_v34 = vsel %vm49_vm1, %v1590_v30, %v1585_v28  ;;  %v239_v35 = vsel %vm49_vm1, %v1591_v29, %v1586_v27  ;;  %v234_v36 = vsel %vm49_vm1, %v1585_v28, %v1590_v30  ;;  %v235_v37 = vsel %vm49_vm1, %v1586_v27, %v1591_v29 }
  0x7e   :  { %v236_v38 = vsel %vm49_vm1, %v1600_v33, %v1595_v25  ;;  %v237_v39 = vsel %vm49_vm1, %v1601_v32, %v1596_v24  ;;  %v1604_v41 = vpop.permute.xlu0 %1603  ;;  %v1457_v42 = vpack.c.bf16 %v239_v35, %v238_v34  ;;  %v1460_v44 = vpack.c.bf16 %v235_v37, %v234_v36 }
  0x7f   :  { %v1609_v45 = vpop.permute.xlu1 %1608  ;;  %v232_v46 = vsel %vm49_vm1, %v1595_v25, %v1600_v33  ;;  %v233_v47 = vsel %vm49_vm1, %v1596_v24, %v1601_v32  ;;  %v1463_v48 = vpack.c.bf16 %v237_v39, %v236_v38  ;;  %v1606_v51 = vunpack.i.h.bf16 %v1604_v41 }
  0x80   :  { %1458 = vmatprep.subr.msk.bf16.mxu0 %vm1942_vm3, %v1457_v42  ;;  %v1605_v52 = vunpack.i.l.bf16 %v1604_v41  ;;  %v1611_v53 = vunpack.i.h.bf16 %v1609_v45  ;;  %v1610_v54 = vunpack.i.l.bf16 %v1609_v45  ;;  %v1466_v56 = vpack.c.bf16 %v233_v47, %v232_v46 }
  0x81   :  { %1461 = vmatpush1.bf16.msk.msra.mxu0 %vm1949_vm4, %v1460_v44 }
  0x82   :  { %v1614_v50 = vpop.permute.xlu0 %1613  ;;  %1464 = vmatprep.subr.msk.bf16.mxu0 %vm1942_vm3, %v1463_v48  ;;  %v146_v59 = vsel %vm142_vm5, %v1606_v51, %v1611_v53  ;;  %v145_v60 = vsel %vm142_vm5, %v1605_v52, %v1610_v54  ;;  %v150_v0 = vsel %vm142_vm5, %v1611_v53, %v1606_v51  ;;  %v149_v1 = vsel %vm142_vm5, %v1610_v54, %v1605_v52  ;;  %v1762_v54 = vld [vmem:[%s2415_s2] ss:$8 sps:$4 sm:$0xff]  }
  0x83   :  { %v1619_v55 = vpop.permute.xlu1 %1618  ;;  %v1616_v63 = vunpack.i.h.bf16 %v1614_v50  ;;  %v1615_v3 = vunpack.i.l.bf16 %v1614_v50  ;;  %v1469_v7 = vpack.c.bf16 %v146_v59, %v145_v60  ;;  %v1472_v2 = vpack.c.bf16 %v150_v0, %v149_v1 }
  0x84   :  { %v1621_v5 = vunpack.i.h.bf16 %v1619_v55  ;;  %v1620_v6 = vunpack.i.l.bf16 %v1619_v55 }
  0x85   :  { %1467 = vmatpush1.bf16.msk.msra.mxu0 %vm1949_vm4, %v1466_v56 }
  0x86   :  { %v1624_v58 = vpop.permute.xlu0 %1623  ;;  %510 = vmatprep.subr.bf16.mxu0 %v1447_v49  ;;  %v144_v20 = vsel %vm142_vm5, %v1616_v63, %v1621_v5  ;;  %v143_v21 = vsel %vm142_vm5, %v1615_v3, %v1620_v6  ;;  %v148_v4 = vsel %vm142_vm5, %v1621_v5, %v1616_v63  ;;  %v147_v24 = vsel %vm142_vm5, %v1620_v6, %v1615_v3  ;;  %v1767_v6 = vld [vmem:[%s2415_s2 + $0x10] ss:$8 sps:$4 sm:$0xff]  }
  0x87   :  { %v1629_v62 = vpop.permute.xlu1 %1628  ;;  %v1626_v8 = vunpack.i.h.bf16 %v1624_v58  ;;  %v1625_v9 = vunpack.i.l.bf16 %v1624_v58  ;;  %v1475_v25 = vpack.c.bf16 %v144_v20, %v143_v21  ;;  %v1478_v35 = vpack.c.bf16 %v148_v4, %v147_v24 }
  0x88   :  { %v1631_v12 = vunpack.i.h.bf16 %v1629_v62  ;;  %v1630_v13 = vunpack.i.l.bf16 %v1629_v62 }
  0x89   :  { %511 = vmatpush1.bf16.msra.mxu0 %v1446_v57 }
  0x8a   :  { %v1634_v11 = vpop.permute.xlu0 %1633  ;;  %512 = vmatprep.subr.bf16.mxu0 %v1445_v61  ;;  %v85_v27 = vsel %vm81_vm9, %v1626_v8, %v1631_v12  ;;  %v84_v28 = vsel %vm81_vm9, %v1625_v9, %v1630_v13  ;;  %v89_v36 = vsel %vm81_vm9, %v1631_v12, %v1626_v8  ;;  %v88_v37 = vsel %vm81_vm9, %v1630_v13, %v1625_v9  ;;  %v1756_v9 = vld [vmem:[%s2413_s1] ss:$8 sps:$4 sm:$0xff]   ;;  %v1759_v12 = vld [vmem:[%s2413_s1 + $0x14] ss:$8 sps:$4 sm:$0xff]   ;;  %v1761_v13 = vld [vmem:[%s2413_s1 + $0x10] ss:$8 sps:$4 sm:$0xff]  }
  0x8b   :  { %v1639_v18 = vpop.permute.xlu1 %1638  ;;  %v1636_v31 = vunpack.i.h.bf16 %v1634_v11  ;;  %v1635_v32 = vunpack.i.l.bf16 %v1634_v11  ;;  %v1481_v38 = vpack.c.bf16 %v85_v27, %v84_v28  ;;  %v1484_v50 = vpack.c.bf16 %v89_v36, %v88_v37 }
  0x8c   :  { %v1641_v33 = vunpack.i.h.bf16 %v1639_v18  ;;  %v1640_v34 = vunpack.i.l.bf16 %v1639_v18 }
  0x8d   :  { %513 = vmatpush1.bf16.msra.mxu0 %v1444_v10 }
  0x8e   :  { %1470 = vmatprep.subr.msk.bf16.mxu0 %vm1987_vm7, %v1469_v7  ;;  %v1644_v29 = vpop.permute.xlu0 %1643  ;;  %v83_v45 = vsel %vm81_vm9, %v1636_v31, %v1641_v33  ;;  %v82_v46 = vsel %vm81_vm9, %v1635_v32, %v1640_v34  ;;  %v87_v51 = vsel %vm81_vm9, %v1641_v33, %v1636_v31  ;;  %v86_v52 = vsel %vm81_vm9, %v1640_v34, %v1635_v32 }
  0x8f   :  { %v1649_v30 = vpop.permute.xlu1 %1648  ;;  %v1646_v39 = vunpack.i.h.bf16 %v1644_v29  ;;  %v1645_v41 = vunpack.i.l.bf16 %v1644_v29  ;;  %v1487_v53 = vpack.c.bf16 %v83_v45, %v82_v46  ;;  %v1490_v61 = vpack.c.bf16 %v87_v51, %v86_v52 }
  0x90   :  { %v1651_v42 = vunpack.i.h.bf16 %v1649_v30  ;;  %v1650_v44 = vunpack.i.l.bf16 %v1649_v30 }
  0x91   :  { %1473 = vmatpush1.bf16.msk.msra.mxu0 %vm1999_vm10, %v1472_v2 }
  0x92   :  { %1476 = vmatprep.subr.msk.bf16.mxu0 %vm1987_vm7, %v1475_v25  ;;  %v1654_v48 = vpop.permute.xlu0 %1653  ;;  %v300_v55 = vsel %vm51_vm14, %v1651_v42, %v1646_v39  ;;  %v299_v56 = vsel %vm51_vm14, %v1650_v44, %v1645_v41  ;;  %v296_v62 = vsel %vm51_vm14, %v1646_v39, %v1651_v42  ;;  %v295_v63 = vsel %vm51_vm14, %v1645_v41, %v1650_v44 }
  0x93   :  { %v1659_v49 = vpop.permute.xlu1 %1658  ;;  %v1656_v57 = vunpack.i.h.bf16 %v1654_v48  ;;  %v1655_v58 = vunpack.i.l.bf16 %v1654_v48  ;;  %v1493_v3 = vpack.c.bf16 %v300_v55, %v299_v56  ;;  %v1496_v0 = vpack.c.bf16 %v296_v62, %v295_v63 }
  0x94   :  { %v1661_v59 = vunpack.i.h.bf16 %v1659_v49  ;;  %v1660_v60 = vunpack.i.l.bf16 %v1659_v49 }
  0x95   :  { %1479 = vmatpush1.bf16.msk.msra.mxu0 %vm1999_vm10, %v1478_v35 }
  0x96   :  { %1482 = vmatprep.subr.msk.bf16.mxu0 %vm2020_vm12, %v1481_v38  ;;  %v298_v5 = vsel %vm51_vm14, %v1661_v59, %v1656_v57  ;;  %v297_v22 = vsel %vm51_vm14, %v1660_v60, %v1655_v58  ;;  %v294_v1 = vsel %vm51_vm14, %v1656_v57, %v1661_v59  ;;  %v293_v7 = vsel %vm51_vm14, %v1655_v58, %v1660_v60 }
  0x97   :  { %v1499_v10 = vpack.c.bf16 %v298_v5, %v297_v22  ;;  %v1502_v8 = vpack.c.bf16 %v294_v1, %v293_v7 }
  0x99   :  { %1485 = vmatpush1.bf16.msk.msra.mxu0 %vm2034_vm15, %v1484_v50 }
  0x9a   :  { %1488 = vmatprep.subr.msk.bf16.mxu0 %vm2020_vm12, %v1487_v53 }
  0x9d   :  { %1491 = vmatpush1.bf16.msk.msra.mxu0 %vm2034_vm15, %v1490_v61 }
  0x9e   :  { %1494 = vmatprep.subr.msk.bf16.mxu0 %vm2055_vm6, %v1493_v3 }
  0x9f   :  { %v374_v21 = vpop.permute.xlu0 %373 }
  0xa0   :  { %v379_v24 = vpop.permute.xlu1 %378 }
  0xa1   :  { %1497 = vmatpush2.bf16.msk.msra.mxu0 %vm2070_vm8, %v1496_v0 }
  0xa2   :  { %1500 = vmatprep.subr.msk.bf16.mxu0 %vm2055_vm6, %v1499_v10 }
  0xa3   :  { %v369_v28 = vpop.permute.xlu0 %368 }
  0xa4   :  { %v364_v37 = vpop.permute.xlu1 %363 }
  0xa5   :  { %1503 = vmatpush2.bf16.msk.msra.mxu0 %vm2070_vm8, %v1502_v8 }
  0xa8   :  { %539 = vmatmul.mubr.bf16.vlgmr.msra.gmra.mxu0 %v1756_v9 }
  0xa9   :  { %1349 = vmatprep.mubr.msk.bf16.mxu0 %vm499_vm0, %v1759_v12 }
  0xb0   :  { %549 = vmatmul.mubr.bf16.gmra.mxu0 %v1761_v13 }
 0x168   :  { %v540_v18 = vpop.f32.mrf.mxu0 }
 0x169   :  { %v541_v45 = vadd.f32 %v540_v18, %v364_v37 }
 0x16a   :  { %v542_v20 = vpop.f32.mrf.mxu0 }
 0x16b   :  { %v543_v39 = vadd.f32 %v542_v20, %v364_v37  ;;  %v559_v53 = vmax.f32 %v541_v45, 0.0 }
 0x16c   :  { %v544_v2 = vpop.f32.mrf.mxu0 }
 0x16d   :  { %v545_v33 = vadd.f32 %v544_v2, %v369_v28  ;;  %v560_v50 = vmax.f32 %v543_v39, 0.0 }
 0x16e   :  { %v546_v4 = vpop.f32.mrf.mxu0 }
 0x16f   :  { %v547_v30 = vadd.f32 %v546_v4, %v369_v28  ;;  %v561_v46 = vmax.f32 %v545_v33, 0.0  ;;  %v567_v55 = vadd.f32 %v560_v50, %v559_v53 }
 0x170   :  { %v550_v25 = vpop.f32.mrf.mxu0 }
 0x171   :  { %v551_v27 = vadd.f32 %v550_v25, %v374_v21  ;;  %v562_v41 = vmax.f32 %v547_v30, 0.0  ;;  %v1802_v30 = vmov 1  }
 0x172   :  { %v552_v29 = vpop.f32.mrf.mxu0  ;;  %1664 = vset.pattern.permute.xlu0 %v1802_v30 }
 0x173   :  { %v553_v31 = vadd.f32 %v552_v29, %v374_v21  ;;  %v563_v34 = vmax.f32 %v551_v27, 0.0  ;;  %v570_v52 = vadd.f32 %v562_v41, %v561_v46  ;;  %v1801_v29 = vmov 2  }
 0x174   :  { %v554_v32 = vpop.f32.mrf.mxu0  ;;  %1665 = vset.pattern.permute.xlu1 %v1801_v29 }
 0x175   :  { %v564_v35 = vmax.f32 %v553_v31, 0.0  ;;  %v555_v36 = vadd.f32 %v554_v32, %v379_v24 }
 0x176   :  { %v556_v38 = vpop.f32.mrf.mxu0 }
 0x177   :  { %v557_v42 = vadd.f32 %v556_v38, %v379_v24  ;;  %v573_v44 = vadd.f32 %v564_v35, %v563_v34  ;;  %v565_v48 = vmax.f32 %v555_v36, 0.0 }
 0x179   :  { %v566_v49 = vmax.f32 %v557_v42, 0.0  ;;  %574 = vadd.xlane.f32.xlu1 %v573_v44 }
 0x17b   :  { %v576_v51 = vadd.f32 %v566_v49, %v565_v48 }
 0x17d   :  { %577 = vadd.xlane.f32.xlu0 %v576_v51  ;;  %571 = vadd.xlane.f32.xlu1 %v570_v52 }
 0x181   :  { %568 = vadd.xlane.f32.xlu0 %v567_v55 }
 0x202   :  { %v575_v56 = vpop.xlane.xlu1 %574 }
 0x203   :  { %v581_v57 = vmul.f32 0.00390625, %v575_v56 }
 0x205   :  { %v2090_v58 = vsub.f32 %v563_v34, %v581_v57  ;;  %v2092_v59 = vsub.f32 %v564_v35, %v581_v57 }
 0x206   :  { %v578_v60 = vpop.xlane.xlu0 %577  ;;  %v572_v61 = vpop.xlane.xlu1 %571 }
 0x207   :  { %v582_v62 = vmul.f32 0.00390625, %v578_v60  ;;  %v580_v63 = vmul.f32 0.00390625, %v572_v61  ;;  %v595_v3 = vmul.f32 %v2090_v58, %v2090_v58  ;;  %v596_v5 = vmul.f32 %v2092_v59, %v2092_v59 }
 0x209   :  { %v2098_v22 = vsub.f32 %v565_v48, %v582_v62  ;;  %v2100_v0 = vsub.f32 %v566_v49, %v582_v62  ;;  %v2102_v1 = vsub.f32 %v561_v46, %v580_v63  ;;  %v2104_v7 = vsub.f32 %v562_v41, %v580_v63 }
 0x20a   :  { %v569_v10 = vpop.xlane.xlu0 %568  ;;  %v605_v8 = vadd.f32 %v596_v5, %v595_v3 }
 0x20b   :  { %v579_v9 = vmul.f32 0.00390625, %v569_v10  ;;  %v597_v12 = vmul.f32 %v2098_v22, %v2098_v22  ;;  %v598_v13 = vmul.f32 %v2100_v0, %v2100_v0  ;;  %v593_v18 = vmul.f32 %v2102_v1, %v2102_v1 }
 0x20c   :  { %606 = vadd.xlane.f32.xlu0 %v605_v8  ;;  %v594_v4 = vmul.f32 %v2104_v7, %v2104_v7 }
 0x20d   :  { %v2112_v20 = vsub.f32 %v559_v53, %v579_v9  ;;  %v2114_v21 = vsub.f32 %v560_v50, %v579_v9  ;;  %v608_v2 = vadd.f32 %v598_v13, %v597_v12 }
 0x20e   :  { %v602_v27 = vadd.f32 %v594_v4, %v593_v18 }
 0x20f   :  { %609 = vadd.xlane.f32.xlu1 %v608_v2  ;;  %v591_v24 = vmul.f32 %v2112_v20, %v2112_v20  ;;  %v592_v25 = vmul.f32 %v2114_v21, %v2114_v21 }
 0x211   :  { %v599_v28 = vadd.f32 %v592_v25, %v591_v24 }
 0x213   :  { %603 = vadd.xlane.f32.xlu1 %v602_v27  ;;  %600 = vadd.xlane.f32.xlu0 %v599_v28 }
 0x224   :  { %664 = vperm.xlu1 %1665, %v1907_v15  }
 0x228   :  { %668 = vperm.xlu1 %1665, %v1902_v14  }
 0x22c   :  { %1666 = vset.pattern.permute.xlu1 %v1802_v30 }
 0x295   :  { %v607_v31 = vpop.xlane.xlu0 %606 }
 0x296   :  { %v613_v32 = vmul.f32 0.00390625, %v607_v31 }
 0x298   :  { %v617_v33 = vadd.f32 1e-05, %v613_v32  ;;  %v610_v34 = vpop.xlane.xlu1 %609  ;;  %v1764_v32 = vld [vmem:[%s2415_s2 + $0x4] ss:$8 sps:$4 sm:$0xff]  }
 0x299   :  { %v614_v41 = vmul.f32 0.00390625, %v610_v34  ;;  %1394 = vmatprep.mubr.msk.bf16.mxu1 %vm499_vm0, %v1764_v32 }
 0x29a   :  { %1768 = vrsqrt.f32 %v617_v33  ;;  %v1803_v33 = vmov 3  }
 0x29b   :  { %v618_v44 = vadd.f32 1e-05, %v614_v41 }
 0x29c   :  { %v604_v35 = vpop.xlane.xlu1 %603  ;;  %v601_v36 = vpop.xlane.xlu0 %600 }
 0x29d   :  { %v612_v37 = vmul.f32 0.00390625, %v604_v35  ;;  %v611_v38 = vmul.f32 0.00390625, %v601_v36 }
 0x29f   :  { %v615_v39 = vadd.f32 1e-05, %v611_v38  ;;  %v616_v42 = vadd.f32 1e-05, %v612_v37 }
 0x2a0   :  { %v665_v55 = vpop.permute.xlu1 %664 }
 0x2a1   :  { %1770 = vrsqrt.f32 %v615_v39 }
 0x2a2   :  { %1772 = vrsqrt.f32 %v616_v42 }
 0x2a3   :  { %1774 = vrsqrt.f32 %v618_v44 }
 0x2a4   :  { %v669_v56 = vpop.permute.xlu1 %668 }
 0x2a7   :  { %v1769_v45 = vpop.eup %1768 }
 0x2a8   :  { %v625_v46 = vmul.f32 %v1769_v45, %v1907_v15 }
 0x2aa   :  { %639 = vperm.xlu0 %1664, %v625_v46  }
 0x2ae   :  { %v1771_v48 = vpop.eup %1770  ;;  %1749 = vset.pattern.permute.xlu0 %v1803_v33 }
 0x2af   :  { %v623_v49 = vmul.f32 %v1771_v48, %v1914_v16  ;;  %v1773_v50 = vpop.eup %1772 }
 0x2b0   :  { %v624_v51 = vmul.f32 %v1773_v50, %v1919_v17  ;;  %v1775_v52 = vpop.eup %1774 }
 0x2b1   :  { %629 = vperm.xlu1 %1666, %v623_v49   ;;  %v626_v53 = vmul.f32 %v1775_v52, %v1902_v14 }
 0x2b5   :  { %634 = vperm.xlu1 %1666, %v624_v51  }
 0x2b9   :  { %644 = vperm.xlu1 %1666, %v626_v53  }
 0x2bd   :  { %1667 = vset.pattern.permute.xlu1 %v1801_v29 }
 0x2be   :  { %656 = vperm.xlu1 %1667, %v1914_v16  }
 0x2c2   :  { %660 = vperm.xlu1 %1667, %v1919_v17  }
 0x2c6   :  { %1748 = vset.pattern.permute.xlu1 %v1803_v33 }
 0x325   :  { %v640_v60 = vpop.permute.xlu0 %639 }
 0x326   :  { %v651_v62 = vmul.f32 %v640_v60, %v2090_v58  ;;  %v652_v63 = vmul.f32 %v640_v60, %v2092_v59 }
 0x328   :  { %v2134_v8 = vadd.f32 %v665_v55, %v651_v62  ;;  %v2136_v9 = vadd.f32 %v665_v55, %v652_v63 }
 0x32c   :  { %v630_v57 = vpop.permute.xlu1 %629 }
 0x32d   :  { %v647_v59 = vmul.f32 %v630_v57, %v2112_v20 }
 0x330   :  { %v635_v61 = vpop.permute.xlu1 %634 }
 0x331   :  { %v649_v4 = vmul.f32 %v635_v61, %v2102_v1  ;;  %v650_v24 = vmul.f32 %v635_v61, %v2104_v7 }
 0x334   :  { %v645_v3 = vpop.permute.xlu1 %644 }
 0x335   :  { %v653_v5 = vmul.f32 %v645_v3, %v2098_v22  ;;  %v654_v10 = vmul.f32 %v645_v3, %v2100_v0  ;;  %v648_v0 = vmul.f32 %v630_v57, %v2114_v21 }
 0x337   :  { %v2138_v12 = vadd.f32 %v669_v56, %v653_v5  ;;  %v2140_v13 = vadd.f32 %v669_v56, %v654_v10 }
 0x339   :  { %v657_v18 = vpop.permute.xlu1 %656  ;;  %v1678_v2 = vpack.i.bf16 %v2140_v13, %v2136_v9  ;;  %v1668_v58 = vpack.i.bf16 %v2138_v12, %v2134_v8  ;;  %v1515_v22 = vpack.c.bf16 %v2140_v13, %v2136_v9  ;;  %v1514_v25 = vpack.c.bf16 %v2138_v12, %v2134_v8 }
 0x33a   :  { %v2156_v28 = vadd.f32 %v657_v18, %v647_v59  ;;  %v2158_v20 = vadd.f32 %v657_v18, %v648_v0 }
 0x33b   :  { %1679 = vrot.lane.b32.xlu0 %v1678_v2, %s1796_s5  ;;  %1669 = vrot.lane.b32.xlu1 %v1668_v58, %s1796_s5 }
 0x33d   :  { %v661_v27 = vpop.permute.xlu1 %660 }
 0x33e   :  { %v2160_v29 = vadd.f32 %v661_v27, %v649_v4  ;;  %v2162_v30 = vadd.f32 %v661_v27, %v650_v24 }
 0x340   :  { %v1683_v31 = vpack.i.bf16 %v2162_v30, %v2158_v20  ;;  %v1673_v1 = vpack.i.bf16 %v2160_v29, %v2156_v28  ;;  %v1513_v7 = vpack.c.bf16 %v2162_v30, %v2158_v20  ;;  %v1512_v21 = vpack.c.bf16 %v2160_v29, %v2156_v28 }
 0x342   :  { %1684 = vrot.lane.b32.xlu0 %v1683_v31, %s1796_s5  ;;  %1674 = vrot.lane.b32.xlu1 %v1673_v1, %s1796_s5 }
 0x346   :  { %1699 = vrot.lane.b32.xlu0 %v1678_v2, %s1797_s6  ;;  %1689 = vrot.lane.b32.xlu1 %v1668_v58, %s1797_s6 }
 0x34a   :  { %1704 = vrot.lane.b32.xlu0 %v1683_v31, %s1797_s6  ;;  %1694 = vrot.lane.b32.xlu1 %v1673_v1, %s1797_s6 }
 0x34e   :  { %1719 = vrot.lane.b32.xlu0 %v1678_v2, %s1798_s7  ;;  %1709 = vrot.lane.b32.xlu1 %v1668_v58, %s1798_s7 }
 0x352   :  { %1724 = vrot.lane.b32.xlu0 %v1683_v31, %s1798_s7  ;;  %1714 = vrot.lane.b32.xlu1 %v1673_v1, %s1798_s7 }
 0x356   :  { %1739 = vrot.lane.b32.xlu0 %v1678_v2, %s1799_s8  ;;  %1729 = vrot.lane.b32.xlu1 %v1668_v58, %s1799_s8 }
 0x35a   :  { %1744 = vrot.lane.b32.xlu0 %v1683_v31, %s1799_s8  ;;  %1734 = vrot.lane.b32.xlu1 %v1673_v1, %s1799_s8 }
 0x35e   :  { %972 = vperm.xlu1 %1748, %v1914_v16   ;;  %976 = vperm.xlu0 %1749, %v1919_v17  }
 0x362   :  { %980 = vperm.xlu1 %1748, %v1907_v15  }
 0x366   :  { %984 = vperm.xlu1 %1748, %v1902_v14  }
 0x3ad   :  { %v1680_v34 = vpop.permute.xlu0 %1679  ;;  %v1670_v35 = vpop.permute.xlu1 %1669 }
 0x3ae   :  { %v1682_v36 = vunpack.i.h.bf16 %v1680_v34  ;;  %v1681_v37 = vunpack.i.l.bf16 %v1680_v34  ;;  %v1672_v38 = vunpack.i.h.bf16 %v1670_v35  ;;  %v1671_v39 = vunpack.i.l.bf16 %v1670_v35 }
 0x3b0   :  { %v849_v41 = vsel %vm49_vm1, %v1681_v37, %v1671_v39  ;;  %v850_v42 = vsel %vm49_vm1, %v1682_v36, %v1672_v38  ;;  %v845_v16 = vsel %vm49_vm1, %v1671_v39, %v1681_v37  ;;  %v846_v15 = vsel %vm49_vm1, %v1672_v38, %v1682_v36 }
 0x3b1   :  { %v1525_v17 = vpack.c.bf16 %v850_v42, %v849_v41  ;;  %v1528_v14 = vpack.c.bf16 %v846_v15, %v845_v16 }
 0x3b3   :  { %1526 = vmatprep.subr.msk.bf16.mxu1 %vm1942_vm3, %v1525_v17 }
 0x3b4   :  { %v1685_v44 = vpop.permute.xlu0 %1684  ;;  %v1675_v45 = vpop.permute.xlu1 %1674  ;;  %1529 = vmatpush1.bf16.msk.msra.mxu1 %vm1949_vm4, %v1528_v14 }
 0x3b5   :  { %v1687_v46 = vunpack.i.h.bf16 %v1685_v44  ;;  %v1686_v48 = vunpack.i.l.bf16 %v1685_v44  ;;  %v1677_v49 = vunpack.i.h.bf16 %v1675_v45  ;;  %v1676_v50 = vunpack.i.l.bf16 %v1675_v45 }
 0x3b7   :  { %v844_v51 = vsel %vm49_vm1, %v1677_v49, %v1687_v46  ;;  %v848_v52 = vsel %vm49_vm1, %v1687_v46, %v1677_v49  ;;  %v843_v53 = vsel %vm49_vm1, %v1676_v50, %v1686_v48  ;;  %v847_v55 = vsel %vm49_vm1, %v1686_v48, %v1676_v50 }
 0x3b8   :  { %v1531_v56 = vpack.c.bf16 %v848_v52, %v847_v55  ;;  %v1534_v57 = vpack.c.bf16 %v844_v51, %v843_v53  ;;  %v1700_v60 = vpop.permute.xlu0 %1699  ;;  %v1690_v61 = vpop.permute.xlu1 %1689 }
 0x3b9   :  { %v1702_v62 = vunpack.i.h.bf16 %v1700_v60  ;;  %v1701_v63 = vunpack.i.l.bf16 %v1700_v60  ;;  %v1692_v3 = vunpack.i.h.bf16 %v1690_v61  ;;  %v1691_v5 = vunpack.i.l.bf16 %v1690_v61 }
 0x3ba   :  { %1532 = vmatprep.subr.msk.bf16.mxu1 %vm1942_vm3, %v1531_v56 }
 0x3bb   :  { %1535 = vmatpush1.bf16.msk.msra.mxu1 %vm1949_vm4, %v1534_v57  ;;  %v758_v2 = vsel %vm142_vm5, %v1692_v3, %v1702_v62  ;;  %v757_v58 = vsel %vm142_vm5, %v1691_v5, %v1701_v63  ;;  %v762_v9 = vsel %vm142_vm5, %v1702_v62, %v1692_v3  ;;  %v761_v13 = vsel %vm142_vm5, %v1701_v63, %v1691_v5 }
 0x3bc   :  { %v1705_v10 = vpop.permute.xlu0 %1704  ;;  %v1695_v18 = vpop.permute.xlu1 %1694  ;;  %1115 = vmatprep.subr.bf16.mxu1 %v1515_v22  ;;  %v1537_v22 = vpack.c.bf16 %v758_v2, %v757_v58  ;;  %v1540_v30 = vpack.c.bf16 %v762_v9, %v761_v13 }
 0x3bd   :  { %v1707_v59 = vunpack.i.h.bf16 %v1705_v10  ;;  %v1706_v0 = vunpack.i.l.bf16 %v1705_v10  ;;  %v1697_v4 = vunpack.i.h.bf16 %v1695_v18  ;;  %v1696_v40 = vunpack.i.l.bf16 %v1695_v18 }
 0x3bf   :  { %1116 = vmatpush1.bf16.msra.mxu1 %v1514_v25  ;;  %v756_v8 = vsel %vm142_vm5, %v1697_v4, %v1707_v59  ;;  %v755_v12 = vsel %vm142_vm5, %v1696_v40, %v1706_v0  ;;  %v759_v33 = vsel %vm142_vm5, %v1706_v0, %v1696_v40 }
 0x3c0   :  { %v1720_v43 = vpop.permute.xlu0 %1719  ;;  %v1710_v24 = vpop.permute.xlu1 %1709  ;;  %1117 = vmatprep.subr.bf16.mxu1 %v1513_v7  ;;  %v760_v7 = vsel %vm142_vm5, %v1707_v59, %v1697_v4  ;;  %v1543_v34 = vpack.c.bf16 %v756_v8, %v755_v12 }
 0x3c1   :  { %v1722_v27 = vunpack.i.h.bf16 %v1720_v43  ;;  %v1721_v31 = vunpack.i.l.bf16 %v1720_v43  ;;  %v1712_v1 = vunpack.i.h.bf16 %v1710_v24  ;;  %v1711_v32 = vunpack.i.l.bf16 %v1710_v24 }
 0x3c2   :  { %v1546_v41 = vpack.c.bf16 %v760_v7, %v759_v33 }
 0x3c3   :  { %1118 = vmatpush1.bf16.msra.mxu1 %v1512_v21  ;;  %v698_v35 = vsel %vm81_vm9, %v1712_v1, %v1722_v27  ;;  %v697_v28 = vsel %vm81_vm9, %v1711_v32, %v1721_v31  ;;  %v702_v42 = vsel %vm81_vm9, %v1722_v27, %v1712_v1  ;;  %v701_v16 = vsel %vm81_vm9, %v1721_v31, %v1711_v32 }
 0x3c4   :  { %v1725_v25 = vpop.permute.xlu0 %1724  ;;  %v1715_v20 = vpop.permute.xlu1 %1714  ;;  %1538 = vmatprep.subr.msk.bf16.mxu1 %vm1987_vm7, %v1537_v22  ;;  %v1549_v15 = vpack.c.bf16 %v698_v35, %v697_v28  ;;  %v1552_v50 = vpack.c.bf16 %v702_v42, %v701_v16 }
 0x3c5   :  { %v1727_v29 = vunpack.i.h.bf16 %v1725_v25  ;;  %v1726_v21 = vunpack.i.l.bf16 %v1725_v25  ;;  %v1717_v36 = vunpack.i.h.bf16 %v1715_v20  ;;  %v1716_v37 = vunpack.i.l.bf16 %v1715_v20 }
 0x3c7   :  { %1541 = vmatpush1.bf16.msk.msra.mxu1 %vm1999_vm10, %v1540_v30  ;;  %v696_v46 = vsel %vm81_vm9, %v1717_v36, %v1727_v29  ;;  %v695_v48 = vsel %vm81_vm9, %v1716_v37, %v1726_v21  ;;  %v700_v51 = vsel %vm81_vm9, %v1727_v29, %v1717_v36  ;;  %v699_v52 = vsel %vm81_vm9, %v1726_v21, %v1716_v37 }
 0x3c8   :  { %v1740_v38 = vpop.permute.xlu0 %1739  ;;  %v1730_v39 = vpop.permute.xlu1 %1729  ;;  %1544 = vmatprep.subr.msk.bf16.mxu1 %vm1987_vm7, %v1543_v34  ;;  %v1555_v53 = vpack.c.bf16 %v696_v46, %v695_v48  ;;  %v1558_v62 = vpack.c.bf16 %v700_v51, %v699_v52 }
 0x3c9   :  { %v1742_v17 = vunpack.i.h.bf16 %v1740_v38  ;;  %v1741_v14 = vunpack.i.l.bf16 %v1740_v38  ;;  %v1732_v44 = vunpack.i.h.bf16 %v1730_v39  ;;  %v1731_v45 = vunpack.i.l.bf16 %v1730_v39 }
 0x3cb   :  { %1547 = vmatpush1.bf16.msk.msra.mxu1 %vm1999_vm10, %v1546_v41  ;;  %v910_v55 = vsel %vm51_vm14, %v1742_v17, %v1732_v44  ;;  %v909_v26 = vsel %vm51_vm14, %v1741_v14, %v1731_v45  ;;  %v906_v63 = vsel %vm51_vm14, %v1732_v44, %v1742_v17  ;;  %v905_v3 = vsel %vm51_vm14, %v1731_v45, %v1741_v14 }
 0x3cc   :  { %v1745_v23 = vpop.permute.xlu0 %1744  ;;  %v1735_v49 = vpop.permute.xlu1 %1734  ;;  %1550 = vmatprep.subr.msk.bf16.mxu1 %vm2020_vm12, %v1549_v15  ;;  %v1561_v5 = vpack.c.bf16 %v910_v55, %v909_v26  ;;  %v1564_v47 = vpack.c.bf16 %v906_v63, %v905_v3 }
 0x3cd   :  { %v1747_v56 = vunpack.i.h.bf16 %v1745_v23  ;;  %v1746_v57 = vunpack.i.l.bf16 %v1745_v23  ;;  %v1737_v60 = vunpack.i.h.bf16 %v1735_v49  ;;  %v1736_v61 = vunpack.i.l.bf16 %v1735_v49 }
 0x3cf   :  { %1553 = vmatpush1.bf16.msk.msra.mxu1 %vm2034_vm15, %v1552_v50  ;;  %v908_v10 = vsel %vm51_vm14, %v1747_v56, %v1737_v60  ;;  %v907_v18 = vsel %vm51_vm14, %v1746_v57, %v1736_v61  ;;  %v904_v2 = vsel %vm51_vm14, %v1737_v60, %v1747_v56  ;;  %v903_v58 = vsel %vm51_vm14, %v1736_v61, %v1746_v57 }
 0x3d0   :  { %1556 = vmatprep.subr.msk.bf16.mxu1 %vm2020_vm12, %v1555_v53  ;;  %v1567_v59 = vpack.c.bf16 %v908_v10, %v907_v18  ;;  %v1570_v0 = vpack.c.bf16 %v904_v2, %v903_v58 }
 0x3d3   :  { %1559 = vmatpush1.bf16.msk.msra.mxu1 %vm2034_vm15, %v1558_v62 }
 0x3d4   :  { %1562 = vmatprep.subr.msk.bf16.mxu1 %vm2055_vm6, %v1561_v5 }
 0x3d7   :  { %1565 = vmatpush2.bf16.msk.msra.mxu1 %vm2070_vm8, %v1564_v47 }
 0x3d8   :  { %1568 = vmatprep.subr.msk.bf16.mxu1 %vm2055_vm6, %v1567_v59 }
 0x3d9   :  { %v973_v4 = vpop.permute.xlu1 %972  ;;  %v977_v9 = vpop.permute.xlu0 %976 }
 0x3db   :  { %1571 = vmatpush2.bf16.msk.msra.mxu1 %vm2070_vm8, %v1570_v0  ;;  %v1804_v0 = vmov 4  }
 0x3dc   :  { %1750 = vset.pattern.permute.xlu1 %v1804_v0  ;;  %1751 = vset.pattern.permute.xlu0 %v1804_v0 }
 0x3dd   :  { %v981_v1 = vpop.permute.xlu1 %980 }
 0x3de   :  { %1144 = vmatmul.mubr.bf16.vlgmr.msra.gmra.mxu1 %v1762_v54 }
 0x3df   :  { %1395 = vmatprep.mubr.msk.bf16.mxu1 %vm499_vm0, %v1765_v19 }
 0x3e1   :  { %v985_v28 = vpop.permute.xlu1 %984 }
 0x3e6   :  { %1154 = vmatmul.mubr.bf16.gmra.mxu1 %v1767_v6 }
 0x49e   :  { %v1145_v40 = vpop.f32.mrf.mxu1 }
 0x49f   :  { %v1146_v43 = vadd.f32 %v1145_v40, %v973_v4 }
 0x4a0   :  { %v1147_v24 = vpop.f32.mrf.mxu1 }
 0x4a1   :  { %v1148_v13 = vadd.f32 %v1147_v24, %v973_v4  ;;  %v1164_v22 = vmax.f32 %v1146_v43, 0.0 }
 0x4a2   :  { %v1149_v11 = vpop.f32.mrf.mxu1 }
 0x4a3   :  { %v1165_v27 = vmax.f32 %v1148_v13, 0.0  ;;  %v1150_v31 = vadd.f32 %v1149_v11, %v977_v9 }
 0x4a4   :  { %v1151_v32 = vpop.f32.mrf.mxu1 }
 0x4a5   :  { %v1152_v8 = vadd.f32 %v1151_v32, %v977_v9  ;;  %v1172_v12 = vadd.f32 %v1165_v27, %v1164_v22  ;;  %v1166_v20 = vmax.f32 %v1150_v31, 0.0  ;;  %v1784_v31 = vld [vmem:[%s2414_s3] sm:$0xff] }
 0x4a6   :  { %v1155_v25 = vpop.f32.mrf.mxu1 }
 0x4a7   :  { %v1167_v30 = vmax.f32 %v1152_v8, 0.0  ;;  %v1156_v7 = vadd.f32 %v1155_v25, %v981_v1  ;;  %1173 = vadd.xlane.f32.xlu0 %v1172_v12  ;;  %v1785_v12 = vld [vmem:[%s2414_s3 + $0x8] sm:$0xff] }
 0x4a8   :  { %v1157_v33 = vpop.f32.mrf.mxu1 }
 0x4a9   :  { %v1158_v34 = vadd.f32 %v1157_v33, %v981_v1  ;;  %v1175_v35 = vadd.f32 %v1167_v30, %v1166_v20  ;;  %v1168_v21 = vmax.f32 %v1156_v7, 0.0  ;;  %v1786_v7 = vld [vmem:[%s2414_s3 + $0x10] sm:$0xff] }
 0x4aa   :  { %v1159_v29 = vpop.f32.mrf.mxu1 }
 0x4ab   :  { %v1169_v36 = vmax.f32 %v1158_v34, 0.0  ;;  %v1160_v37 = vadd.f32 %v1159_v29, %v985_v28  ;;  %1176 = vadd.xlane.f32.xlu1 %v1175_v35  ;;  %v1787_v35 = vld [vmem:[%s2414_s3 + $0x18] sm:$0xff] }
 0x4ac   :  { %v1161_v38 = vpop.f32.mrf.mxu1 }
 0x4ad   :  { %v1162_v39 = vadd.f32 %v1161_v38, %v985_v28  ;;  %v1178_v41 = vadd.f32 %v1169_v36, %v1168_v21  ;;  %v1170_v42 = vmax.f32 %v1160_v37, 0.0 }
 0x4af   :  { %v1171_v16 = vmax.f32 %v1162_v39, 0.0  ;;  %1179 = vadd.xlane.f32.xlu0 %v1178_v41 }
 0x4b1   :  { %v1181_v15 = vadd.f32 %v1171_v16, %v1170_v42 }
 0x4b3   :  { %1182 = vadd.xlane.f32.xlu0 %v1181_v15  ;;  %v1788_v15 = vld [vmem:[%s2412_s0] sm:$0xff] }
 0x530   :  { %v1174_v17 = vpop.xlane.xlu0 %1173 }
 0x531   :  { %v1184_v14 = vmul.f32 0.00390625, %v1174_v17 }
 0x533   :  { %v2312_v44 = vsub.f32 %v1164_v22, %v1184_v14  ;;  %v2314_v45 = vsub.f32 %v1165_v27, %v1184_v14  ;;  %v1789_v14 = vld [vmem:[%s2412_s0 + $0x8] sm:$0xff] }
 0x534   :  { %v1177_v46 = vpop.xlane.xlu1 %1176 }
 0x535   :  { %v1185_v48 = vmul.f32 0.00390625, %v1177_v46  ;;  %v1196_v23 = vmul.f32 %v2312_v44, %v2312_v44  ;;  %v1197_v49 = vmul.f32 %v2314_v45, %v2314_v45 }
 0x537   :  { %v2320_v50 = vsub.f32 %v1166_v20, %v1185_v48  ;;  %v2322_v51 = vsub.f32 %v1167_v30, %v1185_v48  ;;  %v1204_v52 = vadd.f32 %v1197_v49, %v1196_v23  ;;  %v1805_v20 = vmov 5   ;;  %v1790_v23 = vld [vmem:[%s2412_s0 + $0x10] sm:$0xff] }
 0x538   :  { %v1180_v53 = vpop.xlane.xlu0 %1179 }
 0x539   :  { %v1186_v55 = vmul.f32 0.00390625, %v1180_v53  ;;  %1205 = vadd.xlane.f32.xlu1 %v1204_v52  ;;  %v1198_v26 = vmul.f32 %v2320_v50, %v2320_v50  ;;  %v1199_v56 = vmul.f32 %v2322_v51, %v2322_v51 }
 0x53b   :  { %v2328_v57 = vsub.f32 %v1168_v21, %v1186_v55  ;;  %v2330_v60 = vsub.f32 %v1169_v36, %v1186_v55  ;;  %v1207_v61 = vadd.f32 %v1199_v56, %v1198_v26 }
 0x53c   :  { %v1183_v62 = vpop.xlane.xlu0 %1182 }
 0x53d   :  { %v1187_v63 = vmul.f32 0.00390625, %v1183_v62  ;;  %1208 = vadd.xlane.f32.xlu0 %v1207_v61  ;;  %v1200_v3 = vmul.f32 %v2328_v57, %v2328_v57  ;;  %v1201_v5 = vmul.f32 %v2330_v60, %v2330_v60 }
 0x53f   :  { %v2336_v10 = vsub.f32 %v1170_v42, %v1187_v63  ;;  %v2338_v18 = vsub.f32 %v1171_v16, %v1187_v63  ;;  %v1210_v47 = vadd.f32 %v1201_v5, %v1200_v3  ;;  %v1792_v63 = vld [vmem:[%s2412_s0 + $0x20] sm:$0xff]  ;;  %v1793_v5 = vld [vmem:[%s2412_s0 + $0x28] sm:$0xff] }
 0x541   :  { %1211 = vadd.xlane.f32.xlu1 %v1210_v47  ;;  %v1202_v2 = vmul.f32 %v2336_v10, %v2336_v10  ;;  %v1203_v58 = vmul.f32 %v2338_v18, %v2338_v18 }
 0x543   :  { %v1213_v59 = vadd.f32 %v1203_v58, %v1202_v2 }
 0x545   :  { %1214 = vadd.xlane.f32.xlu0 %v1213_v59 }
 0x5c2   :  { %v1206_v54 = vpop.xlane.xlu1 %1205 }
 0x5c3   :  { %v1216_v19 = vmul.f32 0.00390625, %v1206_v54 }
 0x5c5   :  { %v1220_v6 = vadd.f32 1e-05, %v1216_v19  ;;  %v1795_v19 = vld [vmem:[%s2412_s0 + $0x38] sm:$0xff] }
 0x5c6   :  { %v1209_v4 = vpop.xlane.xlu0 %1208 }
 0x5c7   :  { %1776 = vrsqrt.f32 %v1220_v6  ;;  %v1217_v40 = vmul.f32 0.00390625, %v1209_v4 }
 0x5c9   :  { %v1221_v43 = vadd.f32 1e-05, %v1217_v40 }
 0x5ca   :  { %v1212_v24 = vpop.xlane.xlu1 %1211 }
 0x5cb   :  { %1778 = vrsqrt.f32 %v1221_v43  ;;  %v1218_v9 = vmul.f32 0.00390625, %v1212_v24 }
 0x5cd   :  { %v1222_v11 = vadd.f32 1e-05, %v1218_v9 }
 0x5ce   :  { %v1215_v13 = vpop.xlane.xlu0 %1214 }
 0x5cf   :  { %v1219_v22 = vmul.f32 0.00390625, %v1215_v13  ;;  %1780 = vrsqrt.f32 %v1222_v11 }
 0x5d1   :  { %v1223_v32 = vadd.f32 1e-05, %v1219_v22 }
 0x5d3   :  { %1782 = vrsqrt.f32 %v1223_v32 }
 0x5d4   :  { %v1777_v27 = vpop.eup %1776 }
 0x5d5   :  { %v1228_v1 = vmul.f32 %v1784_v31, %v1777_v27 }
 0x5d7   :  { %1234 = vperm.xlu1 %1750, %v1228_v1  }
 0x5d8   :  { %v1779_v8 = vpop.eup %1778 }
 0x5d9   :  { %v1229_v25 = vmul.f32 %v1785_v12, %v1779_v8 }
 0x5db   :  { %1752 = vset.pattern.permute.xlu1 %v1805_v20  ;;  %1239 = vperm.xlu0 %1751, %v1229_v25  }
 0x5dc   :  { %1261 = vperm.xlu1 %1752, %v1784_v31   ;;  %v1781_v30 = vpop.eup %1780 }
 0x5dd   :  { %v1230_v33 = vmul.f32 %v1786_v7, %v1781_v30 }
 0x5df   :  { %1755 = vset.pattern.permute.xlu0 %v1805_v20 }
 0x5e0   :  { %1265 = vperm.xlu1 %1752, %v1785_v12   ;;  %v1783_v34 = vpop.eup %1782 }
 0x5e1   :  { %v1231_v28 = vmul.f32 %v1787_v35, %v1783_v34 }
 0x5e4   :  { %1269 = vperm.xlu1 %1752, %v1786_v7  }
 0x5e8   :  { %1753 = vset.pattern.permute.xlu1 %v1804_v0  ;;  %v1794_v0 = vld [vmem:[%s2412_s0 + $0x30] sm:$0xff] }
 0x5e9   :  { %1244 = vperm.xlu1 %1753, %v1230_v33  }
 0x5ed   :  { %1249 = vperm.xlu1 %1753, %v1231_v28  }
 0x5f1   :  { %1754 = vset.pattern.permute.xlu1 %v1805_v20 }
 0x5f2   :  { %1273 = vperm.xlu1 %1754, %v1787_v35  }
 0x652   :  { %v1235_v29 = vpop.permute.xlu1 %1234 }
 0x653   :  { %v1252_v21 = vmul.f32 %v1235_v29, %v2312_v44  ;;  %v1253_v36 = vmul.f32 %v1235_v29, %v2314_v45 }
 0x656   :  { %v1240_v37 = vpop.permute.xlu0 %1239 }
 0x657   :  { %v1262_v38 = vpop.permute.xlu1 %1261  ;;  %v1254_v42 = vmul.f32 %v1240_v37, %v2320_v50  ;;  %v1255_v16 = vmul.f32 %v1240_v37, %v2322_v51  ;;  %v1791_v50 = vld [vmem:[%s2412_s0 + $0x18] sm:$0xff] }
 0x658   :  { %v1276_v39 = vadd.f32 %v1262_v38, %v1252_v21  ;;  %v1277_v41 = vadd.f32 %v1262_v38, %v1253_v36 }
 0x65a   :  { %v1284_v17 = vadd.f32 %v1788_v15, %v1276_v39  ;;  %v1285_v44 = vadd.f32 %v1789_v14, %v1277_v41 }
 0x65b   :  { %v1266_v46 = vpop.permute.xlu1 %1265 }
 0x65c   :  { %1292 = vst [vmem:[%s2416_s4] sm:$0xff] %v1284_v17  ;;  %1293 = vst [vmem:[%s2416_s4 + $0x8] sm:$0xff] %v1285_v44  ;;  %v1278_v45 = vadd.f32 %v1266_v46, %v1254_v42  ;;  %v1279_v48 = vadd.f32 %v1266_v46, %v1255_v16 }
 0x65e   :  { %v1286_v49 = vadd.f32 %v1790_v23, %v1278_v45  ;;  %v1287_v51 = vadd.f32 %v1791_v50, %v1279_v48 }
 0x65f   :  { %v1270_v52 = vpop.permute.xlu1 %1269 }
 0x660   :  { %1294 = vst [vmem:[%s2416_s4 + $0x10] sm:$0xff] %v1286_v49  ;;  %1295 = vst [vmem:[%s2416_s4 + $0x18] sm:$0xff] %v1287_v51 }
 0x664   :  { %v1245_v53 = vpop.permute.xlu1 %1244 }
 0x665   :  { %v1256_v55 = vmul.f32 %v1245_v53, %v2328_v57  ;;  %v1257_v26 = vmul.f32 %v1245_v53, %v2330_v60 }
 0x667   :  { %v1280_v56 = vadd.f32 %v1270_v52, %v1256_v55  ;;  %v1281_v61 = vadd.f32 %v1270_v52, %v1257_v26 }
 0x668   :  { %v1250_v62 = vpop.permute.xlu1 %1249 }
 0x669   :  { %v1288_v3 = vadd.f32 %v1792_v63, %v1280_v56  ;;  %v1289_v47 = vadd.f32 %v1793_v5, %v1281_v61  ;;  %v1258_v57 = vmul.f32 %v1250_v62, %v2336_v10  ;;  %v1259_v60 = vmul.f32 %v1250_v62, %v2338_v18 }
 0x66b   :  { %1296 = vst [vmem:[%s2416_s4 + $0x20] sm:$0xff] %v1288_v3  ;;  %1297 = vst [vmem:[%s2416_s4 + $0x28] sm:$0xff] %v1289_v47 }
 0x66d   :  { %v1274_v2 = vpop.permute.xlu1 %1273 }
 0x66e   :  { %v1282_v58 = vadd.f32 %v1274_v2, %v1258_v57  ;;  %v1283_v59 = vadd.f32 %v1274_v2, %v1259_v60 }
 0x670   :  { %v1290_v54 = vadd.f32 %v1794_v0, %v1282_v58  ;;  %v1291_v6 = vadd.f32 %v1795_v19, %v1283_v59 }
 0x672   :  { %1298 = vst [vmem:[%s2416_s4 + $0x30] sm:$0xff] %v1290_v54  ;;  %1299 = vst [vmem:[%s2416_s4 + $0x38] sm:$0xff] %v1291_v6 }

</bundles_post_ra>
